<compile_context>
chip_gen: v6e
topology: v6e:2x2x1
jax: 0.10.0
libtpu: 0.0.40
codegen_flags: <defaults>
</compile_context>

<pallas_src>
import math

import numpy as np
import jax
import jax.numpy as jnp
from jax.experimental import pallas as pl
from jax.experimental.pallas import tpu as pltpu  # noqa: F401  (TPU backend import)

# ----------------------- config (small, consistent with the module) -----------------------
B = 2            # batch
T = 8            # sequence length
C = 32           # n_embed
H = 4            # n_heads
KV = 2           # n_kv_heads
D = C // H       # head dim = 8
KVW = KV * D     # kv width = 16
MLP = 64         # n_mlp
EPS = 1e-6       # rms_norm_eps
BT = B * T       # 16 flattened tokens
REP = H // KV    # 2 query heads per kv head

# --- fused-QKV column layout (128 lanes): [q | k | v | q_halfswap | k_halfswap | pad] ---
Q_COL, K_COL, V_COL = 0, C, C + KVW              # 0, 32, 48
QP_COL, KP_COL = 64, 64 + C                      # 64, 96      (pad 112..127)

# --- slab row layout (all offsets multiples of 8; 128 lanes, f32) ---
WQKV_OFF = 0                                     # rows   0.. 31  fused QKV weights
WO_OFF = 32                                      # rows  32.. 63  Wo (lanes 0..31)
WGU_OFF = 64                                     # rows  64.. 95  [Wgate | Wup]
WD_OFF = 96                                      # rows  96..159  Wdown (lanes 0..31)
BIAS_ROW = 160                                   # row 160        fused QKV bias
G1_ROW = 161                                     # row 161        input RMSNorm gain
G2_ROW = 162                                     # row 162        post-attn RMSNorm gain
ROPE_OFF = 168                                   # rows 168..183  RoPE multiplier (per token)
MASK_OFF = 184                                   # rows 184..215  additive mask bias (pair-tiled)
SLAB_ROWS = 216


# ----------------------------------- Pallas kernel -----------------------------------
def block_kernel(x_ref, slab_ref, o_ref):
    x = x_ref[...].astype(jnp.float32)                                   # (BT, C)

    g1 = slab_ref[G1_ROW:G1_ROW + 1, 0:C]                                # (1, C)
    g2 = slab_ref[G2_ROW:G2_ROW + 1, 0:C]                                # (1, C)
    bqkv = slab_ref[BIAS_ROW:BIAS_ROW + 1, :]                            # (1, 128)

    # ---- input RMSNorm ----
    var1 = jnp.mean(x * x, axis=-1, keepdims=True)
    h = x * jax.lax.rsqrt(var1 + EPS) * g1                               # (BT, C)

    # ---- fused QKV projection: full 128-lane, unmasked result ----
    qkv = jnp.dot(h, slab_ref[WQKV_OFF:WQKV_OFF + C, :],
                  preferred_element_type=jnp.float32) + bqkv             # (BT, 128)

    # ---- RoPE for q AND k in one multiply + one 64-lane add (v rides through a lane of ones) ----
    roped = qkv * slab_ref[ROPE_OFF:ROPE_OFF + BT, :]                    # (BT, 128)
    qkvf = roped[:, 0:64] + roped[:, 64:128]                             # (BT, 64)
    q = qkvf[:, Q_COL:Q_COL + C]                                         # (BT, 32)
    k = qkvf[:, K_COL:K_COL + KVW]                                       # (BT, 16)
    v = qkvf[:, V_COL:V_COL + KVW]                                       # (BT, 16)

    # ---- causal GQA attention: both batches at once, two Q heads per KV head stacked on sublanes ----
    mask_bias = slab_ref[MASK_OFF:MASK_OFF + REP * BT, 0:BT]             # (2*BT, BT) additive 0/-1e30
    dn = (((1,), (1,)), ((), ()))                                        # contract last dims (no k.T)
    attn = jnp.zeros((BT, C), jnp.float32)
    for p_idx in range(KV):                                              # static unroll, KV = 2
        q0 = q[:, (REP * p_idx) * D:(REP * p_idx + 1) * D]               # (BT, D)  head 2p
        q1 = q[:, (REP * p_idx + 1) * D:(REP * p_idx + 2) * D]           # (BT, D)  head 2p+1
        qpair = jnp.concatenate([q0, q1], axis=0)                        # (2*BT, D)
        kh = k[:, p_idx * D:(p_idx + 1) * D]                             # (BT, D)
        vh = v[:, p_idx * D:(p_idx + 1) * D]                             # (BT, D)

        s = jax.lax.dot_general(qpair, kh, dimension_numbers=dn,
                                preferred_element_type=jnp.float32)      # (2*BT, BT)
        s = s + mask_bias
        e = jnp.exp(s - jnp.max(s, axis=-1, keepdims=True))
        denom = jnp.sum(e, axis=-1, keepdims=True)
        oh = jnp.dot(e, vh, preferred_element_type=jnp.float32)          # (2*BT, D)
        oh = oh * pl.reciprocal(denom, approx=False)                     # exact (1e-4 tolerance)

        # both heads' Wo rows are contiguous -> one (BT, 2D) x (2D, C) projection per pair
        y_pair = jnp.concatenate([oh[0:BT, :], oh[BT:REP * BT, :]], axis=1)   # (BT, 2D)
        wo_pair = slab_ref[WO_OFF + REP * p_idx * D:WO_OFF + REP * (p_idx + 1) * D, 0:C]
        attn = attn + jnp.dot(y_pair, wo_pair, preferred_element_type=jnp.float32)

    x1 = x + attn                                                        # residual 1

    # ---- post-attention RMSNorm ----
    var2 = jnp.mean(x1 * x1, axis=-1, keepdims=True)
    h2 = x1 * jax.lax.rsqrt(var2 + EPS) * g2

    # ---- SwiGLU MLP (fused gate/up -> lane-dense 128-wide result) ----
    gu = jnp.dot(h2, slab_ref[WGU_OFF:WGU_OFF + C, :],
                 preferred_element_type=jnp.float32)                     # (BT, 128)
    gate, up = gu[:, 0:MLP], gu[:, MLP:2 * MLP]
    act = gate * jax.nn.sigmoid(gate) * up
    mlp = jnp.dot(act, slab_ref[WD_OFF:WD_OFF + MLP, 0:C],
                  preferred_element_type=jnp.float32)                    # (BT, C)

    o_ref[...] = (x1 + mlp).astype(o_ref.dtype)                          # residual 2


# ----------------------------------- one-time packing (host-side numpy) -----------------------------------
def pack_slab(params, cos, sin):
    """Build the single (SLAB_ROWS, 128) weight/bias/rope/mask slab.  Run ONCE outside the call path."""
    scale = 1.0 / math.sqrt(D)
    wq = np.asarray(params["wq"], np.float32) * scale      # fold attention scale into Q projection
    bq = np.asarray(params["bq"], np.float32) * scale
    wk = np.asarray(params["wk"], np.float32)
    bk = np.asarray(params["bk"], np.float32)
    wv = np.asarray(params["wv"], np.float32)
    bv = np.asarray(params["bv"], np.float32)

    # per-head half-swap permutations: the "rotate_half" copies come straight out of the matmul
    perm_head = [(j + D // 2) % D for j in range(D)]
    perm_q = np.array([hd * D + j for hd in range(H) for j in perm_head])
    perm_k = np.array([g * D + j for g in range(KV) for j in perm_head])

    slab = np.zeros((SLAB_ROWS, 128), np.float32)

    # fused QKV weights + biases, column layout [q | k | v | q_halfswap | k_halfswap | pad]
    slab[WQKV_OFF:WQKV_OFF + C, Q_COL:Q_COL + C] = wq
    slab[WQKV_OFF:WQKV_OFF + C, K_COL:K_COL + KVW] = wk
    slab[WQKV_OFF:WQKV_OFF + C, V_COL:V_COL + KVW] = wv
    slab[WQKV_OFF:WQKV_OFF + C, QP_COL:QP_COL + C] = wq[:, perm_q]
    slab[WQKV_OFF:WQKV_OFF + C, KP_COL:KP_COL + KVW] = wk[:, perm_k]
    slab[BIAS_ROW, Q_COL:Q_COL + C] = bq[0]
    slab[BIAS_ROW, K_COL:K_COL + KVW] = bk[0]
    slab[BIAS_ROW, V_COL:V_COL + KVW] = bv[0]
    slab[BIAS_ROW, QP_COL:QP_COL + C] = bq[0, perm_q]
    slab[BIAS_ROW, KP_COL:KP_COL + KVW] = bk[0, perm_k]

    # output / gate / up / down projections and RMSNorm gains
    slab[WO_OFF:WO_OFF + C, 0:C] = np.asarray(params["wo"], np.float32)
    slab[WGU_OFF:WGU_OFF + C, 0:MLP] = np.asarray(params["wg"], np.float32)
    slab[WGU_OFF:WGU_OFF + C, MLP:2 * MLP] = np.asarray(params["wu"], np.float32)
    slab[WD_OFF:WD_OFF + MLP, 0:C] = np.asarray(params["wd"], np.float32)
    slab[G1_ROW, 0:C] = np.asarray(params["g1"], np.float32)[0]
    slab[G2_ROW, 0:C] = np.asarray(params["g2"], np.float32)[0]

    # RoPE multiplier rows:  final = (qkv*rope)[:, :64] + (qkv*rope)[:, 64:]
    # TODO(synk): the 4-D cos/sin `_process_rotary_component` branch (split [16,24,24,...]) is not
    # exercised at these shapes; it would be handled by the same host-side pre-packing.
    cosn = np.asarray(cos, np.float32).reshape(BT, D)
    sinn = np.asarray(sin, np.float32).reshape(BT, D)
    sign = np.array([-1.0] * (D // 2) + [1.0] * (D // 2), np.float32)    # rotate-half sign, pre-folded
    slab[ROPE_OFF:ROPE_OFF + BT, Q_COL:Q_COL + C] = np.tile(cosn, (1, H))
    slab[ROPE_OFF:ROPE_OFF + BT, K_COL:K_COL + KVW] = np.tile(cosn, (1, KV))
    slab[ROPE_OFF:ROPE_OFF + BT, V_COL:V_COL + KVW] = 1.0                # v passes through unchanged
    slab[ROPE_OFF:ROPE_OFF + BT, QP_COL:QP_COL + C] = np.tile(sinn, (1, H)) * np.tile(sign, H)
    slab[ROPE_OFF:ROPE_OFF + BT, KP_COL:KP_COL + KVW] = np.tile(sinn, (1, KV)) * np.tile(sign, KV)

    # block-diagonal (same-batch) causal additive mask bias, tiled for the sublane-stacked head pair
    row = np.arange(BT)
    ok = ((row[:, None] // T) == (row[None, :] // T)) & ((row[:, None] % T) >= (row[None, :] % T))
    bias = np.where(ok, 0.0, -1e30).astype(np.float32)                   # (BT, BT)
    slab[MASK_OFF:MASK_OFF + REP * BT, 0:BT] = np.tile(bias, (REP, 1))

    return jnp.asarray(slab)


# ----------------------------------- per-call wrapper (slab pre-packed) -----------------------------------
@jax.jit
def block_forward(x, slab):
    out = pl.pallas_call(
        block_kernel,
        out_shape=jax.ShapeDtypeStruct((BT, C), x.dtype),
        # grid-less: whole problem (~0.12 MiB) resident in VMEM; default full-array BlockSpecs
    )(x.reshape(BT, C), slab)
    return out.reshape(B, T, C)


# ----------------------------------- pure-JAX reference -----------------------------------
def block_reference(x, cos, sin, params):
    def rmsnorm(x, w):
        var = jnp.mean(x.astype(jnp.float32) ** 2, axis=-1, keepdims=True)
        return (x * jax.lax.rsqrt(var + EPS)) * w[0]

    def rotate_half(t):
        t1, t2 = t[..., : D // 2], t[..., D // 2:]
        return jnp.concatenate([-t2, t1], axis=-1)

    h = rmsnorm(x, params["g1"])
    q = h @ params["wq"] + params["bq"][0]
    k = h @ params["wk"] + params["bk"][0]
    v = h @ params["wv"] + params["bv"][0]
    q = q.reshape(B, T, H, D).transpose(0, 2, 1, 3)
    k = k.reshape(B, T, KV, D).transpose(0, 2, 1, 3)
    v = v.reshape(B, T, KV, D).transpose(0, 2, 1, 3)
    c = cos[:, None, :, :]
    s = sin[:, None, :, :]
    q = q * c + rotate_half(q) * s
    k = k * c + rotate_half(k) * s
    k = jnp.repeat(k, REP, axis=1)
    v = jnp.repeat(v, REP, axis=1)
    scores = jnp.einsum("bhqd,bhkd->bhqk", q, k) / math.sqrt(D)
    mask = jnp.tril(jnp.ones((T, T), dtype=bool))
    scores = jnp.where(mask, scores, -jnp.inf)
    p = jax.nn.softmax(scores, axis=-1)
    y = jnp.einsum("bhqk,bhkd->bhqd", p, v)
    y = y.transpose(0, 2, 1, 3).reshape(B, T, C)
    x1 = x + y @ params["wo"]
    h2 = rmsnorm(x1, params["g2"])
    gate = h2 @ params["wg"]
    up = h2 @ params["wu"]
    mlp = (gate * jax.nn.sigmoid(gate) * up) @ params["wd"]
    return x1 + mlp


# ----------------------------------- main -----------------------------------
if __name__ == "__main__":
    key = jax.random.PRNGKey(0)
    keys = jax.random.split(key, 16)

    def init(k, shape, scale=0.05):
        return jax.random.normal(k, shape, dtype=jnp.float32) * scale

    # Torch Linear weights are (out, in); stored pre-transposed as (in, out).
    params = {
        "g1": jnp.ones((1, C), jnp.float32),
        "wq": init(keys[0], (C, C)),
        "bq": init(keys[1], (1, C)),
        "wk": init(keys[2], (C, KVW)),
        "bk": init(keys[3], (1, KVW)),
        "wv": init(keys[4], (C, KVW)),
        "bv": init(keys[5], (1, KVW)),
        "wo": init(keys[6], (C, C)),
        "g2": jnp.ones((1, C), jnp.float32),
        "wg": init(keys[7], (C, MLP)),
        "wu": init(keys[8], (C, MLP)),
        "wd": init(keys[9], (MLP, C)),
    }

    x = jax.random.normal(keys[10], (B, T, C), dtype=jnp.float32)

    # rotate-half RoPE tables, shape (B, T, D) -> 3-D cos/sin branch of _apply_rotary_pos_emb
    inv_freq = 1.0 / (10000.0 ** (jnp.arange(0, D, 2, dtype=jnp.float32) / D))
    pos = jnp.arange(T, dtype=jnp.float32)
    freqs = pos[:, None] * inv_freq[None, :]                  # (T, D/2)
    emb = jnp.concatenate([freqs, freqs], axis=-1)            # (T, D)
    cos = jnp.broadcast_to(jnp.cos(emb)[None], (B, T, D))
    sin = jnp.broadcast_to(jnp.sin(emb)[None], (B, T, D))

    # pack everything ONCE, outside the per-call path
    slab = pack_slab(params, cos, sin)

    out = block_forward(x, slab)
    out = jax.block_until_ready(out)

    ref = block_reference(x, cos, sin, params)
    assert out.shape == (B, T, C)
    assert jnp.allclose(out, ref, atol=1e-4, rtol=1e-4), "Pallas output mismatch vs JAX reference"

    print("KERNEL_OK")
</pallas_src>

<mosaic_0001>
module attributes {stable_mosaic.version = 11 : i64} {
  func.func @block_kernel(%arg0: memref<16x32xf32, #tpu.memory_space<vmem>>, %arg1: memref<216x128xf32, #tpu.memory_space<vmem>>, %arg2: memref<16x32xf32, #tpu.memory_space<vmem>>) attributes {dimension_semantics = [], scalar_prefetch = 0 : i64, scratch_operands = 0 : i64, tpu.core_type = #tpu.core_type<tc>} {
    %c0 = arith.constant 0 : index
    %c0_0 = arith.constant 0 : index
    %0 = vector.load %arg0[%c0, %c0_0] : memref<16x32xf32, #tpu.memory_space<vmem>>, vector<16x32xf32>
    %c161 = arith.constant 161 : index
    %c0_1 = arith.constant 0 : index
    %1 = vector.load %arg1[%c161, %c0_1] : memref<216x128xf32, #tpu.memory_space<vmem>>, vector<1x32xf32>
    %c162 = arith.constant 162 : index
    %c0_2 = arith.constant 0 : index
    %2 = vector.load %arg1[%c162, %c0_2] : memref<216x128xf32, #tpu.memory_space<vmem>>, vector<1x32xf32>
    %c160 = arith.constant 160 : index
    %c0_3 = arith.constant 0 : index
    %3 = vector.load %arg1[%c160, %c0_3] : memref<216x128xf32, #tpu.memory_space<vmem>>, vector<1x128xf32>
    %4 = arith.mulf %0, %0 : vector<16x32xf32>
    %cst = arith.constant dense<0.000000e+00> : vector<16xf32>
    %5 = vector.multi_reduction <add>, %4, %cst [1] : vector<16x32xf32> to vector<16xf32>
    %6 = vector.shape_cast %5 : vector<16xf32> to vector<16x1xf32>
    %cst_4 = arith.constant 3.200000e+01 : f32
    %7 = vector.broadcast %cst_4 : f32 to vector<16x1xf32>
    %8 = arith.divf %6, %7 : vector<16x1xf32>
    %cst_5 = arith.constant 9.99999997E-7 : f32
    %9 = vector.broadcast %cst_5 : f32 to vector<16x1xf32>
    %10 = arith.addf %8, %9 : vector<16x1xf32>
    %11 = math.rsqrt %10 : vector<16x1xf32>
    %12 = vector.broadcast %11 : vector<16x1xf32> to vector<16x32xf32>
    %13 = arith.mulf %0, %12 : vector<16x32xf32>
    %14 = vector.broadcast %1 : vector<1x32xf32> to vector<16x32xf32>
    %15 = arith.mulf %13, %14 : vector<16x32xf32>
    %c0_6 = arith.constant 0 : index
    %c0_7 = arith.constant 0 : index
    %16 = vector.load %arg1[%c0_6, %c0_7] : memref<216x128xf32, #tpu.memory_space<vmem>>, vector<32x128xf32>
    %cst_8 = arith.constant dense<0.000000e+00> : vector<16x128xf32>
    %17 = tpu.matmul %15, %16, %cst_8 {dimension_numbers = #tpu.dot_dimension_numbers<[1], [0], [0], [1], [0, 0, 1, 1], [], []>} : vector<16x32xf32>, vector<32x128xf32>, vector<16x128xf32> -> vector<16x128xf32>
    %18 = vector.broadcast %3 : vector<1x128xf32> to vector<16x128xf32>
    %19 = arith.addf %17, %18 : vector<16x128xf32>
    %c168 = arith.constant 168 : index
    %c0_9 = arith.constant 0 : index
    %20 = vector.load %arg1[%c168, %c0_9] : memref<216x128xf32, #tpu.memory_space<vmem>>, vector<16x128xf32>
    %21 = arith.mulf %19, %20 : vector<16x128xf32>
    %22 = vector.extract_strided_slice %21 {offsets = [0, 0], sizes = [16, 64], strides = [1, 1]} : vector<16x128xf32> to vector<16x64xf32>
    %23 = vector.extract_strided_slice %21 {offsets = [0, 64], sizes = [16, 64], strides = [1, 1]} : vector<16x128xf32> to vector<16x64xf32>
    %24 = arith.addf %22, %23 : vector<16x64xf32>
    %25 = vector.extract_strided_slice %24 {offsets = [0, 0], sizes = [16, 32], strides = [1, 1]} : vector<16x64xf32> to vector<16x32xf32>
    %26 = vector.extract_strided_slice %24 {offsets = [0, 32], sizes = [16, 16], strides = [1, 1]} : vector<16x64xf32> to vector<16x16xf32>
    %27 = vector.extract_strided_slice %24 {offsets = [0, 48], sizes = [16, 16], strides = [1, 1]} : vector<16x64xf32> to vector<16x16xf32>
    %c184 = arith.constant 184 : index
    %c0_10 = arith.constant 0 : index
    %28 = vector.load %arg1[%c184, %c0_10] : memref<216x128xf32, #tpu.memory_space<vmem>>, vector<32x16xf32>
    %cst_11 = arith.constant 0.000000e+00 : f32
    %29 = vector.broadcast %cst_11 : f32 to vector<16x32xf32>
    %30 = vector.extract_strided_slice %25 {offsets = [0, 0], sizes = [16, 8], strides = [1, 1]} : vector<16x32xf32> to vector<16x8xf32>
    %31 = vector.extract_strided_slice %25 {offsets = [0, 8], sizes = [16, 8], strides = [1, 1]} : vector<16x32xf32> to vector<16x8xf32>
    %32 = tpu.concatenate %30, %31 in 0 : vector<16x8xf32>, vector<16x8xf32> -> vector<32x8xf32>
    %33 = vector.extract_strided_slice %26 {offsets = [0, 0], sizes = [16, 8], strides = [1, 1]} : vector<16x16xf32> to vector<16x8xf32>
    %34 = vector.extract_strided_slice %27 {offsets = [0, 0], sizes = [16, 8], strides = [1, 1]} : vector<16x16xf32> to vector<16x8xf32>
    %cst_12 = arith.constant dense<0.000000e+00> : vector<32x16xf32>
    %35 = tpu.matmul %32, %33, %cst_12 {dimension_numbers = #tpu.dot_dimension_numbers<[1], [1], [0], [0], [0, 0, 1, 0], [], []>} : vector<32x8xf32>, vector<16x8xf32>, vector<32x16xf32> -> vector<32x16xf32>
    %36 = arith.addf %35, %28 : vector<32x16xf32>
    %cst_13 = arith.constant dense<0xFF800000> : vector<32xf32>
    %37 = vector.multi_reduction <maximumf>, %36, %cst_13 [1] : vector<32x16xf32> to vector<32xf32>
    %38 = vector.shape_cast %37 : vector<32xf32> to vector<32x1xf32>
    %39 = vector.broadcast %38 : vector<32x1xf32> to vector<32x16xf32>
    %40 = arith.subf %36, %39 : vector<32x16xf32>
    %41 = math.exp %40 : vector<32x16xf32>
    %cst_14 = arith.constant dense<0.000000e+00> : vector<32xf32>
    %42 = vector.multi_reduction <add>, %41, %cst_14 [1] : vector<32x16xf32> to vector<32xf32>
    %43 = vector.shape_cast %42 : vector<32xf32> to vector<32x1xf32>
    %cst_15 = arith.constant dense<0.000000e+00> : vector<32x8xf32>
    %44 = tpu.matmul %41, %34, %cst_15 {dimension_numbers = #tpu.dot_dimension_numbers<[1], [0], [0], [1], [0, 0, 1, 1], [], []>} : vector<32x16xf32>, vector<16x8xf32>, vector<32x8xf32> -> vector<32x8xf32>
    %45 = tpu.reciprocal %43 : vector<32x1xf32> -> vector<32x1xf32>
    %46 = vector.broadcast %45 : vector<32x1xf32> to vector<32x8xf32>
    %47 = arith.mulf %44, %46 : vector<32x8xf32>
    %48 = vector.extract_strided_slice %47 {offsets = [0, 0], sizes = [16, 8], strides = [1, 1]} : vector<32x8xf32> to vector<16x8xf32>
    %49 = vector.extract_strided_slice %47 {offsets = [16, 0], sizes = [16, 8], strides = [1, 1]} : vector<32x8xf32> to vector<16x8xf32>
    %50 = tpu.concatenate %48, %49 in 1 : vector<16x8xf32>, vector<16x8xf32> -> vector<16x16xf32>
    %c32 = arith.constant 32 : index
    %c0_16 = arith.constant 0 : index
    %51 = vector.load %arg1[%c32, %c0_16] : memref<216x128xf32, #tpu.memory_space<vmem>>, vector<16x32xf32>
    %cst_17 = arith.constant dense<0.000000e+00> : vector<16x32xf32>
    %52 = tpu.matmul %50, %51, %cst_17 {dimension_numbers = #tpu.dot_dimension_numbers<[1], [0], [0], [1], [0, 0, 1, 1], [], []>} : vector<16x16xf32>, vector<16x32xf32>, vector<16x32xf32> -> vector<16x32xf32>
    %53 = arith.addf %29, %52 : vector<16x32xf32>
    %54 = vector.extract_strided_slice %25 {offsets = [0, 16], sizes = [16, 8], strides = [1, 1]} : vector<16x32xf32> to vector<16x8xf32>
    %55 = vector.extract_strided_slice %25 {offsets = [0, 24], sizes = [16, 8], strides = [1, 1]} : vector<16x32xf32> to vector<16x8xf32>
    %56 = tpu.concatenate %54, %55 in 0 : vector<16x8xf32>, vector<16x8xf32> -> vector<32x8xf32>
    %57 = vector.extract_strided_slice %26 {offsets = [0, 8], sizes = [16, 8], strides = [1, 1]} : vector<16x16xf32> to vector<16x8xf32>
    %58 = vector.extract_strided_slice %27 {offsets = [0, 8], sizes = [16, 8], strides = [1, 1]} : vector<16x16xf32> to vector<16x8xf32>
    %cst_18 = arith.constant dense<0.000000e+00> : vector<32x16xf32>
    %59 = tpu.matmul %56, %57, %cst_18 {dimension_numbers = #tpu.dot_dimension_numbers<[1], [1], [0], [0], [0, 0, 1, 0], [], []>} : vector<32x8xf32>, vector<16x8xf32>, vector<32x16xf32> -> vector<32x16xf32>
    %60 = arith.addf %59, %28 : vector<32x16xf32>
    %cst_19 = arith.constant dense<0xFF800000> : vector<32xf32>
    %61 = vector.multi_reduction <maximumf>, %60, %cst_19 [1] : vector<32x16xf32> to vector<32xf32>
    %62 = vector.shape_cast %61 : vector<32xf32> to vector<32x1xf32>
    %63 = vector.broadcast %62 : vector<32x1xf32> to vector<32x16xf32>
    %64 = arith.subf %60, %63 : vector<32x16xf32>
    %65 = math.exp %64 : vector<32x16xf32>
    %cst_20 = arith.constant dense<0.000000e+00> : vector<32xf32>
    %66 = vector.multi_reduction <add>, %65, %cst_20 [1] : vector<32x16xf32> to vector<32xf32>
    %67 = vector.shape_cast %66 : vector<32xf32> to vector<32x1xf32>
    %cst_21 = arith.constant dense<0.000000e+00> : vector<32x8xf32>
    %68 = tpu.matmul %65, %58, %cst_21 {dimension_numbers = #tpu.dot_dimension_numbers<[1], [0], [0], [1], [0, 0, 1, 1], [], []>} : vector<32x16xf32>, vector<16x8xf32>, vector<32x8xf32> -> vector<32x8xf32>
    %69 = tpu.reciprocal %67 : vector<32x1xf32> -> vector<32x1xf32>
    %70 = vector.broadcast %69 : vector<32x1xf32> to vector<32x8xf32>
    %71 = arith.mulf %68, %70 : vector<32x8xf32>
    %72 = vector.extract_strided_slice %71 {offsets = [0, 0], sizes = [16, 8], strides = [1, 1]} : vector<32x8xf32> to vector<16x8xf32>
    %73 = vector.extract_strided_slice %71 {offsets = [16, 0], sizes = [16, 8], strides = [1, 1]} : vector<32x8xf32> to vector<16x8xf32>
    %74 = tpu.concatenate %72, %73 in 1 : vector<16x8xf32>, vector<16x8xf32> -> vector<16x16xf32>
    %c48 = arith.constant 48 : index
    %c0_22 = arith.constant 0 : index
    %75 = vector.load %arg1[%c48, %c0_22] : memref<216x128xf32, #tpu.memory_space<vmem>>, vector<16x32xf32>
    %cst_23 = arith.constant dense<0.000000e+00> : vector<16x32xf32>
    %76 = tpu.matmul %74, %75, %cst_23 {dimension_numbers = #tpu.dot_dimension_numbers<[1], [0], [0], [1], [0, 0, 1, 1], [], []>} : vector<16x16xf32>, vector<16x32xf32>, vector<16x32xf32> -> vector<16x32xf32>
    %77 = arith.addf %53, %76 : vector<16x32xf32>
    %78 = arith.addf %0, %77 : vector<16x32xf32>
    %79 = arith.mulf %78, %78 : vector<16x32xf32>
    %cst_24 = arith.constant dense<0.000000e+00> : vector<16xf32>
    %80 = vector.multi_reduction <add>, %79, %cst_24 [1] : vector<16x32xf32> to vector<16xf32>
    %81 = vector.shape_cast %80 : vector<16xf32> to vector<16x1xf32>
    %cst_25 = arith.constant 3.200000e+01 : f32
    %82 = vector.broadcast %cst_25 : f32 to vector<16x1xf32>
    %83 = arith.divf %81, %82 : vector<16x1xf32>
    %cst_26 = arith.constant 9.99999997E-7 : f32
    %84 = vector.broadcast %cst_26 : f32 to vector<16x1xf32>
    %85 = arith.addf %83, %84 : vector<16x1xf32>
    %86 = math.rsqrt %85 : vector<16x1xf32>
    %87 = vector.broadcast %86 : vector<16x1xf32> to vector<16x32xf32>
    %88 = arith.mulf %78, %87 : vector<16x32xf32>
    %89 = vector.broadcast %2 : vector<1x32xf32> to vector<16x32xf32>
    %90 = arith.mulf %88, %89 : vector<16x32xf32>
    %c64 = arith.constant 64 : index
    %c0_27 = arith.constant 0 : index
    %91 = vector.load %arg1[%c64, %c0_27] : memref<216x128xf32, #tpu.memory_space<vmem>>, vector<32x128xf32>
    %cst_28 = arith.constant dense<0.000000e+00> : vector<16x128xf32>
    %92 = tpu.matmul %90, %91, %cst_28 {dimension_numbers = #tpu.dot_dimension_numbers<[1], [0], [0], [1], [0, 0, 1, 1], [], []>} : vector<16x32xf32>, vector<32x128xf32>, vector<16x128xf32> -> vector<16x128xf32>
    %93 = vector.extract_strided_slice %92 {offsets = [0, 0], sizes = [16, 64], strides = [1, 1]} : vector<16x128xf32> to vector<16x64xf32>
    %94 = vector.extract_strided_slice %92 {offsets = [0, 64], sizes = [16, 64], strides = [1, 1]} : vector<16x128xf32> to vector<16x64xf32>
    %95 = arith.negf %93 : vector<16x64xf32>
    %96 = math.exp %95 : vector<16x64xf32>
    %cst_29 = arith.constant 1.000000e+00 : f32
    %97 = vector.broadcast %cst_29 : f32 to vector<16x64xf32>
    %98 = arith.addf %97, %96 : vector<16x64xf32>
    %99 = arith.divf %97, %98 : vector<16x64xf32>
    %100 = arith.mulf %93, %99 : vector<16x64xf32>
    %101 = arith.mulf %100, %94 : vector<16x64xf32>
    %c96 = arith.constant 96 : index
    %c0_30 = arith.constant 0 : index
    %102 = vector.load %arg1[%c96, %c0_30] : memref<216x128xf32, #tpu.memory_space<vmem>>, vector<64x32xf32>
    %cst_31 = arith.constant dense<0.000000e+00> : vector<16x32xf32>
    %103 = tpu.matmul %101, %102, %cst_31 {dimension_numbers = #tpu.dot_dimension_numbers<[1], [0], [0], [1], [0, 0, 1, 1], [], []>} : vector<16x64xf32>, vector<64x32xf32>, vector<16x32xf32> -> vector<16x32xf32>
    %104 = arith.addf %78, %103 : vector<16x32xf32>
    %c0_32 = arith.constant 0 : index
    %c0_33 = arith.constant 0 : index
    %105 = vector.load %arg2[%c0_32, %c0_33] : memref<16x32xf32, #tpu.memory_space<vmem>>, vector<16x32xf32>
    tpu.vector_store %arg2[%c0_32, %c0_33], %104 {strides = array<i32>} : memref<16x32xf32, #tpu.memory_space<vmem>>, vector<16x32xf32>,
    return
  }
}

</mosaic_0001>

<bundles_post_ra>
// kernel: block_forward.1
= control target key start
LH: loop header
LB: loop body
LE: loop exit
PB: predicated region body
PF: predicated region fallthrough
CT: control target
= control target key end

     0   :  { %7 = vsyncpa [#allocation3], 0  ;;  %s1582_s0 = inlined_call_operand.hbm [shape: f32[16,32], index: 0, kind: input, shape index: {}]   ;;  %s1583_s1 = inlined_call_operand.hbm [shape: f32[216,128], index: 1, kind: input, shape index: {}]   ;;  %s1584_s2 = inlined_call_operand.hbm [shape: f32[16,32], index: 2, kind: output, shape index: {}]  }
   0x1   :  { %8 = vsyncpa [#allocation6], 0 }
   0x2   :  { %9 = vsyncpa [#allocation4], 0  ;;  %s1429_s9 = smov [#allocation2]  }
   0x3   :  { %s15_s10 = sshll.u32 %s1429_s9, 4  ;;  %s16_s10 = int_to_ptr.vmem [resolvable:$true] %s15_s10 }
   0x4   :  { %s1371_s11 = scalar_lea.vmem %s16_s10, 256  ;;  %p1376_p1 = scmp.lt.s32.totalorder %s16_s10, %s16_s10 }
   0x5   :  { %p1372_p0 = scmp.ne.s32.totalorder %s16_s10, %s1371_s11  ;;  %p1377_p2 = scmp.lt.s32.totalorder %s1371_s11, %s1371_s11 }
   0x7   :  { %p1378_p3 = por %p1377_p2, %p1376_p1 }
   0x9   :  { %p1379_p4 = pnand %p1378_p3, %p1372_p0 }
   0xb   :  { %1382 = shalt.err (!%p1379_p4)
}
   0xc   :  { %s1430_s12 = smov 128   ;;  %s1431_s13 = smov 8  }
   0xd   :  { %21 = dma.hbm_to_vmem [thread:$0]  %s1582_s0, 256, %s16_s10, [#allocation3], %s1430_s12, %s1430_s12, %s1431_s13  }
   0xe   :  { %s1432_s16 = smov [#allocation5]  }
   0xf   :  { %s27_s17 = sshll.u32 %s1432_s16, 4  ;;  %s28_s17 = int_to_ptr.vmem [resolvable:$true] %s27_s17 }
  0x10   :  { %s1391_s18 = scalar_lea.vmem %s28_s17, 3456  ;;  %p1396_p6 = scmp.lt.s32.totalorder %s28_s17, %s28_s17 }
  0x11   :  { %p1392_p5 = scmp.ne.s32.totalorder %s28_s17, %s1391_s18  ;;  %p1397_p7 = scmp.lt.s32.totalorder %s1391_s18, %s1391_s18 }
  0x13   :  { %p1398_p8 = por %p1397_p7, %p1396_p6 }
  0x15   :  { %p1399_p9 = pnand %p1398_p8, %p1392_p5 }
  0x17   :  { %1402 = shalt.err (!%p1399_p9)
}
  0x18   :  { %33 = dma.hbm_to_vmem [thread:$0]  %s1583_s1, 3456, %s28_s17, [#allocation6], %s1430_s12, %s1430_s12, %s1431_s13  }
  0x19   :  { %1423 = dma.done.wait [#allocation3], 256  }
  0x1a   :  { %1424 = vsyncadd [#allocation3], 4294967040 }
  0x1b   :  { %1425 = dma.done.wait [#allocation6], 3456  }
  0x1c   :  { %1426 = vsyncadd [#allocation6], 4294963840  ;;  %v1468_v0 = vld [vmem:[#allocation2] sm:$0xff]  ;;  %vm47_vm0 = vcmask 261120   ;;  %v1470_v1 = vld [vmem:[#allocation2 + $0x8] sm:$0xff]  ;;  %s1433_s0 = smov 64  }
  0x1d   :  { %v45_v2 = vmul.f32 %v1468_v0, %v1468_v0  ;;  %v46_v3 = vmul.f32 %v1470_v1, %v1470_v1  ;;  %v72_v6 = vld [vmem:[#allocation5 + $0x18] sm:$0xff]  ;;  %v71_v7 = vld [vmem:[#allocation5 + $0x10] sm:$0xff]  ;;  %v70_v8 = vld [vmem:[#allocation5 + $0x8] sm:$0xff]  ;;  %vm186_vm1 = vcmask 64512   ;;  %s1434_s1 = smov 120   ;;  %s1435_s21 = smov 112  }
  0x1e   :  { %1208 = vmatprep.subr.mxu0 %v72_v6  ;;  %v69_v9 = vld [vmem:[#allocation5] sm:$0xff]  ;;  %v158_v26 = vld [vmem:[#allocation5 + $0xa8] sm:$0xff]  ;;  %v159_v30 = vld [vmem:[#allocation5 + $0xb0] sm:$0xff]  ;;  %s1436_s22 = smov 96   ;;  %s1437_s23 = smov 88   ;;  %vm284_vm2 = vcmask 130048  }
  0x1f   :  { %v48_v4 = vsel %vm47_vm0, %v45_v2, 0.0  ;;  %v51_v5 = vsel %vm47_vm0, %v46_v3, 0.0  ;;  %1209 = vmatpush3.msra.mxu0 %v72_v6  ;;  %v1119_v17 = vld [vmem:[#allocation5 + $0xa1] ss:$0 sm:$0xff]  ;;  %v1120_v24 = vld [vmem:[#allocation5 + $0xa0] ss:$0 sm:$0xff] }
  0x20   :  { %49 = vadd.xlane.f32.xlu0 %v48_v4  ;;  %1210 = vmatprep.subr.mxu0 %v71_v7  ;;  %s1438_s24 = smov 80   ;;  %v173_v48 = vld [vmem:[#allocation5 + $0xc0] sm:$0xff]  ;;  %v172_v50 = vld [vmem:[#allocation5 + $0xb8] sm:$0xff]  ;;  %v175_v53 = vld [vmem:[#allocation5 + $0xd0] sm:$0xff]  ;;  %s1439_s25 = smov 72   ;;  %vm1015_vm3 = vcmask 523264  }
  0x21   :  { %1211 = vmatpush3.msra.mxu0 %v71_v7  ;;  %v174_v57 = vld [vmem:[#allocation5 + $0xc8] sm:$0xff]  ;;  %s1440_s26 = smov [#allocation7]  }
  0x22   :  { %1212 = vmatprep.subr.mxu0 %v70_v8  ;;  %s1106_s27 = sshll.u32 %s1440_s26, 4  ;;  %s1107_s27 = int_to_ptr.vmem [resolvable:$true] %s1106_s27 }
  0x23   :  { %1213 = vmatpush3.msra.mxu0 %v70_v8  ;;  %s1403_s28 = scalar_lea.vmem %s1107_s27, 256  ;;  %p1408_p11 = scmp.lt.s32.totalorder %s1107_s27, %s1107_s27 }
  0x24   :  { %52 = vadd.xlane.f32.xlu0 %v51_v5  ;;  %1214 = vmatprep.subr.mxu0 %v69_v9  ;;  %p1404_p10 = scmp.ne.s32.totalorder %s1107_s27, %s1403_s28  ;;  %p1409_p12 = scmp.lt.s32.totalorder %s1403_s28, %s1403_s28 }
  0x25   :  { %1215 = vmatpush3.msra.mxu0 %v69_v9 }
  0x26   :  { %p1410_p13 = por %p1409_p12, %p1408_p11 }
  0x28   :  { %p1411_p0 = pnand %p1410_p13, %p1404_p10 }
  0xa9   :  { %v50_v10 = vpop.xlane.xlu0 %49 }
  0xaa   :  { %v55_v11 = vmul.f32 0.03125, %v50_v10 }
  0xac   :  { %v57_v12 = vadd.f32 1e-06, %v55_v11 }
  0xad   :  { %v53_v13 = vpop.xlane.xlu0 %52 }
  0xae   :  { %1315 = vrsqrt.f32 %v57_v12  ;;  %v56_v14 = vmul.f32 0.03125, %v53_v13 }
  0xb0   :  { %v58_v15 = vadd.f32 1e-06, %v56_v14 }
  0xb2   :  { %1317 = vrsqrt.f32 %v58_v15 }
  0xbb   :  { %v1316_v16 = vpop.eup %1315 }
  0xbc   :  { %v61_v18 = vmul.f32 %v1316_v16, %v1468_v0 }
  0xbe   :  { %v67_v19 = vmul.f32 %v1119_v17, %v61_v18 }
  0xbf   :  { %v1318_v20 = vpop.eup %1317 }
  0xc0   :  { %v62_v21 = vmul.f32 %v1318_v20, %v1470_v1  ;;  %1216 = vmatprep.mubr.msk.f32.mxu0 %vm47_vm0, %v67_v19 }
  0xc2   :  { %v68_v22 = vmul.f32 %v1119_v17, %v62_v21 }
  0xc4   :  { %1217 = vmatmul.mubr.msk.f32.vlgmr.msra.gmra.mxu0 %vm47_vm0, %v68_v22 }
 0x184   :  { %v1218_v23 = vpop.f32.mrf.mxu0 }
 0x185   :  { %v155_v28 = vadd.f32 %v1218_v23, %v1120_v24 }
 0x186   :  { %v149_v25 = vpop.f32.mrf.mxu0 }
 0x187   :  { %v150_v27 = vadd.f32 %v1120_v24, %v149_v25  ;;  %v161_v31 = vmul.f32 %v159_v30, %v155_v28 }
 0x189   :  { %v160_v29 = vmul.f32 %v158_v26, %v150_v27 }
 0x18b   :  { %164 = vrot.lane.b32.xlu1 %v160_v29, %s1433_s0 }
 0x18f   :  { %166 = vrot.lane.b32.xlu1 %v161_v31, %s1433_s0 }
 0x1fd   :  { %v165_v32 = vpop.permute.xlu1 %164 }
 0x1fe   :  { %v1484_v33 = vadd.f32 %v165_v32, %v160_v29 }
 0x200   :  { %178 = vrot.lane.b32.xlu0 %v1484_v33, %s1434_s1  ;;  %1223 = vmatprep.mubr.msk.f32.mxu1 %vm186_vm1, %v1484_v33 }
 0x201   :  { %v167_v34 = vpop.permute.xlu1 %166 }
 0x202   :  { %v1489_v35 = vadd.f32 %v167_v34, %v161_v31 }
 0x204   :  { %446 = vrot.lane.b32.xlu0 %v1489_v35, %s1435_s21  ;;  %180 = vrot.lane.b32.xlu1 %v1489_v35, %s1434_s1 }
 0x208   :  { %184 = vrot.lane.b32.xlu1 %v1489_v35, %s1436_s22 }
 0x20c   :  { %182 = vrot.lane.b32.xlu1 %v1484_v33, %s1436_s22 }
 0x210   :  { %454 = vrot.lane.b32.xlu1 %v1489_v35, %s1437_s23 }
 0x214   :  { %452 = vrot.lane.b32.xlu1 %v1484_v33, %s1437_s23 }
 0x218   :  { %444 = vrot.lane.b32.xlu1 %v1484_v33, %s1435_s21 }
 0x272   :  { %v179_v36 = vpop.permute.xlu0 %178 }
 0x273   :  { %448 = vrot.lane.b32.xlu1 %v179_v36, %s1435_s21 }
 0x276   :  { %v181_v37 = vpop.permute.xlu1 %180  ;;  %v447_v43 = vpop.permute.xlu0 %446 }
 0x277   :  { %321 = vrot.lane.b32.xlu1 %v1484_v33, %s1438_s24  ;;  %450 = vrot.lane.b32.xlu0 %v181_v37, %s1435_s21 }
 0x27a   :  { %v185_v38 = vpop.permute.xlu1 %184 }
 0x27b   :  { %323 = vrot.lane.b32.xlu0 %v1489_v35, %s1438_s24  ;;  %1219 = vmatprep.subr.msk.mxu1 %vm186_vm1, %v185_v38 }
 0x27c   :  { %1220 = vmatpush3.xpose.msk.msra.mxu1 %vm186_vm1, %v185_v38 }
 0x27e   :  { %v183_v39 = vpop.permute.xlu1 %182 }
 0x27f   :  { %1221 = vmatprep.subr.msk.mxu1 %vm186_vm1, %v183_v39 }
 0x280   :  { %1222 = vmatpush3.xpose.msk.msra.mxu1 %vm186_vm1, %v183_v39 }
 0x282   :  { %v455_v40 = vpop.permute.xlu1 %454 }
 0x283   :  { %1224 = vmatmul.mubr.msk.f32.vlgmr.msra.gmra.mxu1 %vm186_vm1, %v1489_v35  ;;  %1239 = vmatprep.subr.msk.mxu1 %vm186_vm1, %v455_v40 }
 0x284   :  { %1226 = vmatprep.mubr.msk.f32.mxu1 %vm186_vm1, %v179_v36  ;;  %1240 = vmatpush3.xpose.msk.msra.mxu1 %vm186_vm1, %v455_v40 }
 0x286   :  { %v453_v41 = vpop.permute.xlu1 %452 }
 0x287   :  { %1227 = vmatmul.mubr.msk.f32.gmra.mxu1 %vm186_vm1, %v181_v37  ;;  %1241 = vmatprep.subr.msk.mxu1 %vm186_vm1, %v453_v41 }
 0x288   :  { %1242 = vmatpush3.xpose.msk.msra.mxu1 %vm186_vm1, %v453_v41 }
 0x28a   :  { %v445_v42 = vpop.permute.xlu1 %444 }
 0x28b   :  { %1243 = vmatprep.mubr.msk.f32.mxu1 %vm186_vm1, %v445_v42 }
 0x28c   :  { %1244 = vmatmul.mubr.msk.f32.vlgmr.msra.gmra.mxu1 %vm186_vm1, %v447_v43 }
 0x2e5   :  { %v449_v44 = vpop.permute.xlu1 %448 }
 0x2e6   :  { %1246 = vmatprep.mubr.msk.f32.mxu1 %vm186_vm1, %v449_v44 }
 0x2e9   :  { %v451_v45 = vpop.permute.xlu0 %450  ;;  %v322_v47 = vpop.permute.xlu1 %321 }
 0x2ea   :  { %1247 = vmatmul.mubr.msk.f32.gmra.mxu1 %vm186_vm1, %v451_v45 }
 0x2ed   :  { %v324_v46 = vpop.permute.xlu0 %323 }
 0x2ee   :  { %1229 = vmatprep.subr.mxu0 %v324_v46 }
 0x2ef   :  { %1230 = vmatpush3.msra.mxu0 %v324_v46 }
 0x2f0   :  { %1231 = vmatprep.subr.mxu0 %v322_v47 }
 0x2f1   :  { %1232 = vmatpush3.msra.mxu0 %v322_v47 }
 0x343   :  { %v1225_v49 = vpop.f32.mrf.mxu1 }
 0x344   :  { %v271_v51 = vadd.f32 %v1225_v49, %v173_v48 }
 0x345   :  { %v265_v52 = vpop.f32.mrf.mxu1 }
 0x346   :  { %v266_v54 = vadd.f32 %v265_v52, %v172_v50  ;;  %v288_v55 = vsel %vm284_vm2, %v271_v51, -inf }
 0x347   :  { %289 = vmax.xlane.f32.xlu0 %v288_v55  ;;  %v1228_v56 = vpop.f32.mrf.mxu1 }
 0x348   :  { %v281_v58 = vadd.f32 %v1228_v56, %v175_v53  ;;  %v285_v59 = vsel %vm284_vm2, %v266_v54, -inf  ;;  %v711_v56 = vld [vmem:[#allocation5 + $0x38] sm:$0xff] }
 0x349   :  { %v275_v60 = vpop.f32.mrf.mxu1  ;;  %286 = vmax.xlane.f32.xlu1 %v285_v59  ;;  %1259 = vmatprep.subr.mxu1 %v711_v56 }
 0x34a   :  { %v276_v61 = vadd.f32 %v275_v60, %v174_v57  ;;  %v294_v2 = vsel %vm284_vm2, %v281_v58, -inf  ;;  %1260 = vmatpush3.msra.mxu1 %v711_v56 }
 0x34c   :  { %v1245_v62 = vpop.f32.mrf.mxu1  ;;  %v291_v63 = vsel %vm284_vm2, %v276_v61, -inf }
 0x34d   :  { %v540_v3 = vadd.f32 %v1245_v62, %v173_v48  ;;  %292 = vmax.xlane.f32.xlu0 %v291_v63  ;;  %295 = vmax.xlane.f32.xlu1 %v294_v2 }
 0x34e   :  { %v534_v4 = vpop.f32.mrf.mxu1 }
 0x34f   :  { %v535_v5 = vadd.f32 %v534_v4, %v172_v50  ;;  %v556_v6 = vsel %vm284_vm2, %v540_v3, -inf  ;;  %v443_v4 = vld [vmem:[#allocation5 + $0x28] sm:$0xff] }
 0x351   :  { %557 = vmax.xlane.f32.xlu1 %v556_v6  ;;  %v553_v7 = vsel %vm284_vm2, %v535_v5, -inf }
 0x352   :  { %554 = vmax.xlane.f32.xlu0 %v553_v7 }
 0x3aa   :  { %v1248_v8 = vpop.f32.mrf.mxu1 }
 0x3ab   :  { %v550_v9 = vadd.f32 %v1248_v8, %v175_v53 }
 0x3ac   :  { %v544_v10 = vpop.f32.mrf.mxu1 }
 0x3ad   :  { %v545_v11 = vadd.f32 %v544_v10, %v174_v57  ;;  %v562_v12 = vsel %vm284_vm2, %v550_v9, -inf  ;;  %v710_v57 = vld [vmem:[#allocation5 + $0x30] sm:$0xff] }
 0x3ae   :  { %563 = vmax.xlane.f32.xlu1 %v562_v12  ;;  %1261 = vmatprep.subr.mxu1 %v710_v57 }
 0x3af   :  { %v559_v13 = vsel %vm284_vm2, %v545_v11, -inf  ;;  %1262 = vmatpush3.msra.mxu1 %v710_v57 }
 0x3b0   :  { %560 = vmax.xlane.f32.xlu0 %v559_v13  ;;  %1266 = vmatprep.subr.mxu1 %v443_v4 }
 0x3bf   :  { %591 = vrot.lane.b32.xlu1 %v1489_v35, %s1439_s25 }
 0x3c6   :  { %589 = vrot.lane.b32.xlu0 %v1484_v33, %s1439_s25 }
 0x3d0   :  { %v290_v14 = vpop.xlane.xlu0 %289 }
 0x3d1   :  { %v298_v15 = vsub.f32 %v271_v51, %v290_v14 }
 0x3d2   :  { %v287_v16 = vpop.xlane.xlu1 %286 }
 0x3d3   :  { %v297_v17 = vsub.f32 %v266_v54, %v287_v16  ;;  %v303_v18 = vmul.f32 1.442695, %v298_v15 }
 0x3d5   :  { %v301_v19 = vmul.f32 1.442695, %v297_v17 }
 0x3d6   :  { %v293_v20 = vpop.xlane.xlu0 %292  ;;  %v296_v21 = vpop.xlane.xlu1 %295 }
 0x3d7   :  { %1319 = vpow2.f32 %v301_v19  ;;  %v299_v22 = vsub.f32 %v276_v61, %v293_v20  ;;  %v300_v23 = vsub.f32 %v281_v58, %v296_v21 }
 0x3d8   :  { %1321 = vpow2.f32 %v303_v18 }
 0x3d9   :  { %v305_v24 = vmul.f32 1.442695, %v299_v22  ;;  %v307_v25 = vmul.f32 1.442695, %v300_v23 }
 0x3da   :  { %v558_v34 = vpop.xlane.xlu1 %557 }
 0x3db   :  { %1323 = vpow2.f32 %v305_v24  ;;  %v555_v26 = vpop.xlane.xlu0 %554  ;;  %v566_v35 = vsub.f32 %v540_v3, %v558_v34 }
 0x3dc   :  { %1325 = vpow2.f32 %v307_v25  ;;  %v565_v27 = vsub.f32 %v535_v5, %v555_v26 }
 0x3dd   :  { %v571_v36 = vmul.f32 1.442695, %v566_v35 }
 0x3de   :  { %v569_v28 = vmul.f32 1.442695, %v565_v27 }
 0x3e0   :  { %1327 = vpow2.f32 %v569_v28 }
 0x3e1   :  { %1329 = vpow2.f32 %v571_v36 }
 0x3e4   :  { %v1320_v29 = vpop.eup %1319 }
 0x3e5   :  { %v1322_v30 = vpop.eup %1321  ;;  %1233 = vmatprep.mubr.msk.f32.mxu0 %vm284_vm2, %v1320_v29  ;;  %v309_v54 = vsel %vm284_vm2, %v1320_v29, 0.0 }
 0x3e6   :  { %1234 = vmatmul.mubr.msk.f32.vlgmr.msra.gmra.mxu0 %vm284_vm2, %v1322_v30  ;;  %v312_v55 = vsel %vm284_vm2, %v1322_v30, 0.0 }
 0x3e8   :  { %v1324_v31 = vpop.eup %1323 }
 0x3e9   :  { %v1326_v32 = vpop.eup %1325  ;;  %1236 = vmatprep.mubr.msk.f32.mxu0 %vm284_vm2, %v1324_v31  ;;  %v315_v50 = vsel %vm284_vm2, %v1324_v31, 0.0 }
 0x3ea   :  { %1237 = vmatmul.mubr.msk.f32.gmra.mxu0 %vm284_vm2, %v1326_v32  ;;  %v318_v51 = vsel %vm284_vm2, %v1326_v32, 0.0 }
 0x3ed   :  { %v1328_v33 = vpop.eup %1327 }
 0x3ee   :  { %1253 = vmatprep.mubr.msk.f32.mxu0 %vm284_vm2, %v1328_v33  ;;  %v1330_v45 = vpop.eup %1329  ;;  %v577_v52 = vsel %vm284_vm2, %v1328_v33, 0.0  ;;  %v442_v33 = vld [vmem:[#allocation5 + $0x20] sm:$0xff] }
 0x3ef   :  { %v580_v53 = vsel %vm284_vm2, %v1330_v45, 0.0 }
 0x437   :  { %v564_v37 = vpop.xlane.xlu1 %563 }
 0x438   :  { %v568_v38 = vsub.f32 %v550_v9, %v564_v37 }
 0x439   :  { %v561_v39 = vpop.xlane.xlu0 %560 }
 0x43a   :  { %v575_v40 = vmul.f32 1.442695, %v568_v38  ;;  %v567_v41 = vsub.f32 %v545_v11, %v561_v39 }
 0x43b   :  { %v592_v42 = vpop.permute.xlu1 %591 }
 0x43c   :  { %1331 = vpow2.f32 %v575_v40  ;;  %v573_v43 = vmul.f32 1.442695, %v567_v41  ;;  %1249 = vmatprep.subr.mxu0 %v592_v42 }
 0x43d   :  { %v590_v44 = vpop.permute.xlu0 %589  ;;  %1250 = vmatpush3.msra.mxu0 %v592_v42 }
 0x43e   :  { %1333 = vpow2.f32 %v573_v43  ;;  %1251 = vmatprep.subr.mxu0 %v590_v44 }
 0x43f   :  { %1252 = vmatpush3.msra.mxu0 %v590_v44 }
 0x440   :  { %1254 = vmatmul.mubr.msk.f32.vlgmr.msra.gmra.mxu0 %vm284_vm2, %v1330_v45 }
 0x449   :  { %v1332_v46 = vpop.eup %1331 }
 0x44a   :  { %v586_v47 = vsel %vm284_vm2, %v1332_v46, 0.0 }
 0x44b   :  { %v1334_v48 = vpop.eup %1333  ;;  %587 = vadd.xlane.f32.xlu0 %v586_v47 }
 0x44c   :  { %1256 = vmatprep.mubr.msk.f32.mxu0 %vm284_vm2, %v1334_v48  ;;  %v583_v49 = vsel %vm284_vm2, %v1334_v48, 0.0 }
 0x44d   :  { %584 = vadd.xlane.f32.xlu1 %v583_v49  ;;  %1257 = vmatmul.mubr.msk.f32.gmra.mxu0 %vm284_vm2, %v1332_v46 }
 0x44f   :  { %316 = vadd.xlane.f32.xlu0 %v315_v50  ;;  %v901_v50 = vld [vmem:[#allocation5 + $0x58] sm:$0xff] }
 0x451   :  { %319 = vadd.xlane.f32.xlu1 %v318_v51  ;;  %v900_v51 = vld [vmem:[#allocation5 + $0x50] sm:$0xff] }
 0x453   :  { %578 = vadd.xlane.f32.xlu0 %v577_v52 }
 0x455   :  { %581 = vadd.xlane.f32.xlu1 %v580_v53 }
 0x457   :  { %310 = vadd.xlane.f32.xlu0 %v309_v54 }
 0x459   :  { %313 = vadd.xlane.f32.xlu1 %v312_v55 }
 0x4a6   :  { %v1235_v58 = vpop.f32.mrf.mxu0 }
 0x4a8   :  { %v405_v61 = vpop.f32.mrf.mxu0 }
 0x4aa   :  { %v1238_v63 = vpop.f32.mrf.mxu0 }
 0x4ac   :  { %v415_v3 = vpop.f32.mrf.mxu0 }
 0x4d4   :  { %v588_v59 = vpop.xlane.xlu0 %587 }
 0x4d5   :  { %1335 = vrcp.f32 %v588_v59 }
 0x4d6   :  { %v585_v60 = vpop.xlane.xlu1 %584 }
 0x4d7   :  { %1337 = vrcp.f32 %v585_v60 }
 0x4d8   :  { %v317_v62 = vpop.xlane.xlu0 %316 }
 0x4d9   :  { %1339 = vrcp.f32 %v317_v62 }
 0x4da   :  { %v320_v2 = vpop.xlane.xlu1 %319 }
 0x4db   :  { %1341 = vrcp.f32 %v320_v2 }
 0x4dc   :  { %v579_v17 = vpop.xlane.xlu0 %578 }
 0x4dd   :  { %1343 = vrcp.f32 %v579_v17 }
 0x4de   :  { %v582_v18 = vpop.xlane.xlu1 %581 }
 0x4e0   :  { %v311_v19 = vpop.xlane.xlu0 %310 }
 0x4e1   :  { %1345 = vrcp.f32 %v311_v19 }
 0x4e2   :  { %v1336_v7 = vpop.eup %1335  ;;  %v314_v20 = vpop.xlane.xlu1 %313  ;;  %1347 = vrcp.f32 %v582_v18 }
 0x4e3   :  { %1349 = vrcp.f32 %v314_v20 }
 0x4e4   :  { %v1338_v9 = vpop.eup %1337 }
 0x4e6   :  { %v1340_v11 = vpop.eup %1339 }
 0x4e7   :  { %v430_v15 = vmul.f32 %v1340_v11, %v415_v3  ;;  %v1014_v3 = vld [vmem:[#allocation5 + $0x98] sm:$0xff] }
 0x4e8   :  { %v1342_v14 = vpop.eup %1341  ;;  %1284 = vmatprep.subr.mxu0 %v1014_v3 }
 0x4e9   :  { %v431_v16 = vmul.f32 %v1342_v14, %v1238_v63  ;;  %1285 = vmatpush3.msra.mxu0 %v1014_v3 }
 0x4ea   :  { %v1344_v21 = vpop.eup %1343 }
 0x4ee   :  { %v1346_v22 = vpop.eup %1345 }
 0x4ef   :  { %v1348_v24 = vpop.eup %1347  ;;  %v428_v30 = vmul.f32 %v1346_v22, %v405_v61  ;;  %v1147_v61 = vld [vmem:[#allocation5 + $0xa2] ss:$0 sm:$0xff] }
 0x4f0   :  { %v1350_v26 = vpop.eup %1349 }
 0x4f1   :  { %v429_v35 = vmul.f32 %v1350_v26, %v1235_v58 }
 0x500   :  { %v1255_v5 = vpop.f32.mrf.mxu0 }
 0x501   :  { %v697_v27 = vmul.f32 %v1348_v24, %v1255_v5  ;;  %v1012_v5 = vld [vmem:[#allocation5 + $0x88] sm:$0xff] }
 0x502   :  { %v673_v6 = vpop.f32.mrf.mxu0 }
 0x503   :  { %v696_v25 = vmul.f32 %v1344_v21, %v673_v6  ;;  %v1011_v6 = vld [vmem:[#allocation5 + $0x80] sm:$0xff] }
 0x50d   :  { %v1258_v8 = vpop.f32.mrf.mxu0 }
 0x50e   :  { %v699_v10 = vmul.f32 %v1336_v7, %v1258_v8  ;;  %v1010_v7 = vld [vmem:[#allocation5 + $0x78] sm:$0xff]  ;;  %v1009_v8 = vld [vmem:[#allocation5 + $0x70] sm:$0xff] }
 0x50f   :  { %v683_v12 = vpop.f32.mrf.mxu0 }
 0x510   :  { %v698_v13 = vmul.f32 %v1338_v9, %v683_v12  ;;  %704 = vrot.lane.b32.xlu1 %v699_v10, %s1431_s13  ;;  %v1008_v9 = vld [vmem:[#allocation5 + $0x68] sm:$0xff]  ;;  %v1007_v10 = vld [vmem:[#allocation5 + $0x60] sm:$0xff] }
 0x512   :  { %702 = vrot.lane.b32.xlu0 %v698_v13, %s1431_s13 }
 0x514   :  { %434 = vrot.lane.b32.xlu1 %v430_v15, %s1431_s13 }
 0x516   :  { %436 = vrot.lane.b32.xlu0 %v431_v16, %s1431_s13 }
 0x582   :  { %v705_v23 = vpop.permute.xlu1 %704 }
 0x583   :  { %v709_v31 = vsel %vm186_vm1, %v697_v27, %v705_v23 }
 0x584   :  { %v703_v28 = vpop.permute.xlu0 %702 }
 0x585   :  { %v708_v29 = vsel %vm186_vm1, %v696_v25, %v703_v28 }
 0x586   :  { %1263 = vmatprep.mubr.msk.f32.mxu1 %vm284_vm2, %v708_v29  ;;  %v435_v32 = vpop.permute.xlu1 %434 }
 0x587   :  { %v440_v34 = vsel %vm186_vm1, %v428_v30, %v435_v32  ;;  %1264 = vmatmul.mubr.msk.f32.vlgmr.msra.gmra.mxu1 %vm284_vm2, %v709_v31 }
 0x588   :  { %1267 = vmatpush3.msra.mxu1 %v443_v4  ;;  %v437_v36 = vpop.permute.xlu0 %436  ;;  %1270 = vmatprep.mubr.msk.f32.mxu1 %vm284_vm2, %v440_v34  ;;  %v1013_v4 = vld [vmem:[#allocation5 + $0x90] sm:$0xff] }
 0x589   :  { %v441_v37 = vsel %vm186_vm1, %v429_v35, %v437_v36  ;;  %1268 = vmatprep.subr.mxu1 %v442_v33  ;;  %1286 = vmatprep.subr.mxu0 %v1013_v4 }
 0x58a   :  { %1269 = vmatpush3.msra.mxu1 %v442_v33  ;;  %1287 = vmatpush3.msra.mxu0 %v1013_v4 }
 0x58b   :  { %1271 = vmatmul.mubr.msk.f32.vlgmr.msra.gmra.mxu1 %vm284_vm2, %v441_v37  ;;  %1273 = vmatprep.subr.mxu1 %v901_v50 }
 0x58c   :  { %1274 = vmatpush3.msra.mxu1 %v901_v50  ;;  %1288 = vmatprep.subr.mxu0 %v1012_v5 }
 0x58d   :  { %1275 = vmatprep.subr.mxu1 %v900_v51  ;;  %1289 = vmatpush3.msra.mxu0 %v1012_v5 }
 0x58e   :  { %1276 = vmatpush3.msra.mxu1 %v900_v51  ;;  %1290 = vmatprep.subr.mxu0 %v1011_v6 }
 0x58f   :  { %1291 = vmatpush3.msra.mxu0 %v1011_v6 }
 0x590   :  { %1292 = vmatprep.subr.mxu0 %v1010_v7 }
 0x591   :  { %1293 = vmatpush3.msra.mxu0 %v1010_v7 }
 0x592   :  { %1294 = vmatprep.subr.mxu0 %v1009_v8 }
 0x593   :  { %1295 = vmatpush3.msra.mxu0 %v1009_v8 }
 0x594   :  { %1296 = vmatprep.subr.mxu0 %v1008_v9 }
 0x595   :  { %1297 = vmatpush3.msra.mxu0 %v1008_v9 }
 0x596   :  { %1298 = vmatprep.subr.mxu0 %v1007_v10 }
 0x597   :  { %1299 = vmatpush3.msra.mxu0 %v1007_v10 }
 0x647   :  { %v1265_v38 = vpop.f32.mrf.mxu1 }
 0x649   :  { %v784_v39 = vpop.f32.mrf.mxu1 }
 0x64b   :  { %v1272_v40 = vpop.f32.mrf.mxu1 }
 0x64c   :  { %v871_v41 = vadd.f32 %v1272_v40, %v1265_v38 }
 0x64d   :  { %v865_v42 = vpop.f32.mrf.mxu1 }
 0x64e   :  { %v1555_v43 = vadd.f32 %v871_v41, %v1470_v1  ;;  %v866_v44 = vadd.f32 %v865_v42, %v784_v39  ;;  %v899_v1 = vld [vmem:[#allocation5 + $0x48] sm:$0xff] }
 0x64f   :  { %1277 = vmatprep.subr.mxu1 %v899_v1 }
 0x650   :  { %v1558_v45 = vadd.f32 %v866_v44, %v1468_v0  ;;  %v877_v46 = vmul.f32 %v1555_v43, %v1555_v43  ;;  %v898_v0 = vld [vmem:[#allocation5 + $0x40] sm:$0xff]  ;;  %1278 = vmatpush3.msra.mxu1 %v899_v1 }
 0x651   :  { %1279 = vmatprep.subr.mxu1 %v898_v0 }
 0x652   :  { %v881_v47 = vsel %vm47_vm0, %v877_v46, 0.0  ;;  %v876_v48 = vmul.f32 %v1558_v45, %v1558_v45  ;;  %1280 = vmatpush3.msra.mxu1 %v898_v0 }
 0x653   :  { %882 = vadd.xlane.f32.xlu0 %v881_v47 }
 0x654   :  { %v878_v49 = vsel %vm47_vm0, %v876_v48, 0.0 }
 0x655   :  { %879 = vadd.xlane.f32.xlu1 %v878_v49 }
 0x6dc   :  { %v883_v52 = vpop.xlane.xlu0 %882 }
 0x6dd   :  { %v885_v53 = vmul.f32 0.03125, %v883_v52 }
 0x6de   :  { %v880_v54 = vpop.xlane.xlu1 %879 }
 0x6df   :  { %v887_v55 = vadd.f32 1e-06, %v885_v53  ;;  %v884_v56 = vmul.f32 0.03125, %v880_v54 }
 0x6e1   :  { %1351 = vrsqrt.f32 %v887_v55  ;;  %v886_v57 = vadd.f32 1e-06, %v884_v56 }
 0x6e3   :  { %1353 = vrsqrt.f32 %v886_v57 }
 0x6ee   :  { %v1352_v58 = vpop.eup %1351 }
 0x6ef   :  { %v891_v60 = vmul.f32 %v1352_v58, %v1555_v43 }
 0x6f0   :  { %v1354_v59 = vpop.eup %1353 }
 0x6f1   :  { %v890_v62 = vmul.f32 %v1354_v59, %v1558_v45  ;;  %v897_v2 = vmul.f32 %v1147_v61, %v891_v60 }
 0x6f3   :  { %v896_v63 = vmul.f32 %v1147_v61, %v890_v62 }
 0x6f5   :  { %1281 = vmatprep.mubr.msk.f32.mxu1 %vm47_vm0, %v896_v63 }
 0x6f6   :  { %1282 = vmatmul.mubr.msk.f32.vlgmr.msra.gmra.mxu1 %vm47_vm0, %v897_v2 }
 0x7b6   :  { %v1283_v11 = vpop.f32.mrf.mxu1 }
 0x7b7   :  { %1001 = vrot.lane.b32.xlu1 %v1283_v11, %s1433_s0  ;;  %v1151_v14 = vmul.f32 -1.442695, %v1283_v11 }
 0x7b8   :  { %v974_v12 = vpop.f32.mrf.mxu1 }
 0x7b9   :  { %999 = vrot.lane.b32.xlu0 %v974_v12, %s1433_s0  ;;  %v1150_v13 = vmul.f32 -1.442695, %v974_v12 }
 0x7bb   :  { %1355 = vpow2.f32 %v1150_v13 }
 0x7bc   :  { %1357 = vpow2.f32 %v1151_v14 }
 0x7c8   :  { %v1356_v15 = vpop.eup %1355 }
 0x7c9   :  { %v1358_v16 = vpop.eup %1357  ;;  %v989_v17 = vadd.f32 1.0, %v1356_v15 }
 0x7ca   :  { %v990_v18 = vadd.f32 1.0, %v1358_v16 }
 0x7cb   :  { %1359 = vrcp.f32 %v989_v17 }
 0x7cc   :  { %1361 = vrcp.f32 %v990_v18 }
 0x7d8   :  { %v1360_v19 = vpop.eup %1359 }
 0x7d9   :  { %v1362_v20 = vpop.eup %1361  ;;  %v995_v21 = vmul.f32 %v1360_v19, %v974_v12 }
 0x7da   :  { %v996_v23 = vmul.f32 %v1362_v20, %v1283_v11 }
 0x829   :  { %v1002_v22 = vpop.permute.xlu1 %1001 }
 0x82a   :  { %v1006_v26 = vmul.f32 %v1002_v22, %v996_v23 }
 0x82b   :  { %v1000_v24 = vpop.permute.xlu0 %999 }
 0x82c   :  { %v1005_v25 = vmul.f32 %v1000_v24, %v995_v21 }
 0x82e   :  { %1300 = vmatprep.mubr.msk.f32.mxu0 %vm1015_vm3, %v1005_v25 }
 0x82f   :  { %1301 = vmatmul.mubr.msk.f32.vlgmr.msra.gmra.mxu0 %vm1015_vm3, %v1006_v26 }
 0x8ef   :  { %v1302_v27 = vpop.f32.mrf.mxu0 }
 0x8f0   :  { %v1098_v28 = vadd.f32 %v1302_v27, %v1555_v43 }
 0x8f1   :  { %v1088_v29 = vpop.f32.mrf.mxu0 }
 0x8f2   :  { %1100 = vst.msk [vmem:[#allocation7 + $0x8] sm:$0xff] %vm47_vm0, %v1098_v28  ;;  %v1097_v30 = vadd.f32 %v1088_v29, %v1558_v45 }
 0x8f4   :  { %1099 = vst.msk [vmem:[#allocation7] sm:$0xff] %vm47_vm0, %v1097_v30 }
 0x8f5   :  { %1414 = shalt.err (!%p1411_p0)
}
 0x8f6   :  { %1112 = dma.vmem_to_hbm [thread:$0]  %s1107_s27, 256, %s1584_s2, [#allocation4], %s1430_s12, %s1430_s12, %s1431_s13  }
 0x8f7   :  { %1427 = dma.done.wait [#allocation4], 256  }
 0x8f8   :  { %1428 = vsyncadd [#allocation4], 4294967040 }
 0x8f9   :  { %1116 = vsyncpa [#allocation3], 1 }
 0x8fa   :  { %1117 = vsyncpa [#allocation6], 1 }
 0x8fb   :  { %1118 = vsyncpa [#allocation4], 1 }

</bundles_post_ra>
